<compile_context>
chip_gen: v6e
topology: v6e:2x2x1
jax: 0.10.0
libtpu: 0.0.40
codegen_flags: <defaults>
</compile_context>

<pallas_src>
import jax
import jax.numpy as jnp
from jax.experimental import pallas as pl
from jax.experimental.pallas import tpu as pltpu

_LANE = 128          # vreg lane width: padded (resident) dims use this
_MIB = 1024 * 1024


def _round_up(n, m):
    return ((n + m - 1) // m) * m


def _sublane_granule(dtype):
    """Row granularity keeping packed sublanes dense (f32:8, bf16:16, 8-bit:32)."""
    return 8 * max(1, 4 // jnp.dtype(dtype).itemsize)


def _num_tensorcores():
    """Perf-only heuristic: 1 TC on v5e/v6e, 2 on v7x / megacore chips."""
    try:
        kind = jax.devices()[0].device_kind.lower()
    except Exception:
        return 1
    return 2 if any(t in kind for t in ("v7", "v4", "v5p", "v5 p")) else 1


def _default_vmem_budget():
    """Generation-aware VMEM budget for the double-buffered per-step footprint."""
    phys = 64 * _MIB                      # conservative default: v7x physical VMEM
    try:
        phys = pltpu.get_tpu_info().vmem_capacity_bytes
    except Exception:
        pass
    return min(40 * _MIB, int(phys * 0.6))


def _mlp_kernel(x_ref, w1_ref, b1_ref, w2_ref, b2_ref, o_ref):
    """Fused Linear -> ReLU -> Linear on one batch tile, fully VMEM-resident."""
    # Feed the MXU in the weight dtype (bf16 fast path on all generations,
    # including v5e); no-op cast when x already matches.  Accumulate in f32.
    x = x_ref[...].astype(w1_ref.dtype)
    h = jnp.dot(x, w1_ref[...], preferred_element_type=jnp.float32)
    # Epilogue (bias + ReLU) stays in f32: cheap everywhere, required on v5e
    # (no bf16 VPU there).
    h = jnp.maximum(h + b1_ref[...], 0.0)
    o = jnp.dot(h.astype(w2_ref.dtype), w2_ref[...],
                preferred_element_type=jnp.float32)
    o_ref[...] = (o + b2_ref[...]).astype(o_ref.dtype)


def prepare_params(w1, b1, w2, b2, *, matmul_dtype=None):
    """One-time layout/cast of the (small, VMEM-resident) parameters.

    w1: (d_in, d_h), w2: (d_h, d_out) -- transposed wrt PyTorch's (out, in),
    so the kernel computes x @ W + b (== PyTorch's x @ W.T + b).

    Only the hidden dim is zero-padded (to a lane multiple).  Padding is exact:
    padded hidden columns have weight 0 / bias 0, ReLU(0) = 0, and the padded
    rows of w2 are 0, so they contribute nothing to the output.
    """
    d_in, d_h = w1.shape
    d_out = w2.shape[1]
    mm_dtype = w1.dtype if matmul_dtype is None else jnp.dtype(matmul_dtype)
    d_h_p = _round_up(d_h, _LANE)
    w1_p = jnp.zeros((d_in, d_h_p), mm_dtype).at[:, :d_h].set(w1.astype(mm_dtype))
    b1_p = jnp.zeros((1, d_h_p), jnp.float32).at[:, :d_h].set(
        b1.astype(jnp.float32).reshape(1, d_h))
    w2_p = jnp.zeros((d_h_p, d_out), mm_dtype).at[:d_h, :].set(w2.astype(mm_dtype))
    b2_p = b2.astype(jnp.float32).reshape(1, d_out)
    return w1_p, b1_p, w2_p, b2_p


def _pick_batch_tile(requested, batch, granule, footprint, budget, num_tc):
    """Largest batch tile that fits the VMEM budget; on multi-TC chips keep at
    least `num_tc` grid steps (when the batch allows) so every core gets work.
    Single-TC chips (v5e/v6e): the grid is a serial loop, so take the max tile."""
    b_full = _round_up(batch, granule)
    bt = min(_round_up(max(requested, granule), granule), b_full)
    if num_tc > 1:
        per_core = _round_up(-(-batch // num_tc), granule)
        if per_core >= granule and bt > per_core:
            bt = per_core
    while footprint(bt) > budget and bt > granule:
        bt = max(granule, (bt // 2) // granule * granule)
    return bt


_SINGLE_BUFFER_WEIGHTS_OK = [True]   # flipped off if pl.Buffered(1) is rejected


def net_forward(x, w1_p, b1_p, w2_p, b2_p, *, batch_tile=512,
                vmem_budget_bytes=None):
    """Fused Sequential(Linear(d_in,d_h), ReLU(), Linear(d_h,d_out)) forward.

    Parameters must come from `prepare_params` (hidden dim pre-padded, weights
    pre-cast), so the per-call path does no padding/casting of the parameters.
    x is streamed at its natural feature width / dtype; only the batch dim is
    padded, and only when it is not a multiple of the chosen batch tile.
    """
    B, D_IN = x.shape
    d_h_p = w1_p.shape[1]
    D_OUT = w2_p.shape[1]
    assert w1_p.shape[0] == D_IN and b1_p.shape == (1, d_h_p)
    assert w2_p.shape == (d_h_p, D_OUT) and b2_p.shape == (1, D_OUT)

    x_bytes = jnp.dtype(x.dtype).itemsize
    w_bytes = jnp.dtype(w1_p.dtype).itemsize
    o_bytes = x_bytes                        # output keeps the input dtype
    granule = _sublane_granule(x.dtype)
    budget = _default_vmem_budget() if vmem_budget_bytes is None else vmem_budget_bytes

    def footprint(t):                        # conservative: weights double-buffered
        return (2 * t * D_IN * x_bytes                              # x tile (2 bufs)
                + 2 * t * D_OUT * o_bytes                           # out tile (2 bufs)
                + t * d_h_p * 4                                     # hidden act (f32)
                + 2 * (D_IN * d_h_p + d_h_p * D_OUT) * w_bytes      # weights
                + 2 * (d_h_p + D_OUT) * 4)                          # biases

    bt = _pick_batch_tile(batch_tile, B, granule, footprint, budget,
                          _num_tensorcores())
    B_pad = _round_up(B, bt)
    x_p = x if B_pad == B else jnp.zeros((B_pad, D_IN), x.dtype).at[:B].set(x)

    cost = pl.CostEstimate(
        flops=2 * B_pad * (D_IN * d_h_p + d_h_p * D_OUT),
        transcendentals=0,
        bytes_accessed=(B_pad * D_IN * x_bytes + B_pad * D_OUT * o_bytes
                        + (D_IN * d_h_p + d_h_p * D_OUT) * w_bytes
                        + (d_h_p + D_OUT) * 4))

    def run(single_buffer_weights):
        if single_buffer_weights:
            # Constant index maps -> blocks never change; a single buffer halves
            # their resident VMEM (matters for large flexnet hidden sizes).
            def const_spec(shape):
                return pl.BlockSpec(shape, lambda i: (0, 0),
                                    pipeline_mode=pl.Buffered(1))
        else:
            def const_spec(shape):
                return pl.BlockSpec(shape, lambda i: (0, 0))

        return pl.pallas_call(
            _mlp_kernel,
            out_shape=jax.ShapeDtypeStruct((B_pad, D_OUT), x.dtype),
            grid_spec=pltpu.PrefetchScalarGridSpec(
                num_scalar_prefetch=0,
                grid=(B_pad // bt,),
                in_specs=[
                    # x streamed at natural width (block last dim == full dim).
                    pl.BlockSpec((bt, D_IN), lambda i: (i, 0)),
                    const_spec((D_IN, d_h_p)),    # W1 (resident)
                    const_spec((1, d_h_p)),       # b1
                    const_spec((d_h_p, D_OUT)),   # W2
                    const_spec((1, D_OUT)),       # b2
                ],
                # Unpadded output block: ~8x less HBM writeback than a padded
                # 128-lane block for D_OUT=16; the masked VMEM store is the
                # cheaper side of that trade on a mem-bound kernel.
                out_specs=pl.BlockSpec((bt, D_OUT), lambda i: (i, 0)),
            ),
            compiler_params=pltpu.CompilerParams(
                dimension_semantics=("parallel",),   # shard batch tiles across TCs
                vmem_limit_bytes=int(budget),
            ),
            cost_estimate=cost,
        )(x_p, w1_p, b1_p, w2_p, b2_p)

    if _SINGLE_BUFFER_WEIGHTS_OK[0]:
        try:
            out = run(True)
        except Exception:
            # pl.Buffered(1) unsupported by this jax/backend combo; fall back to
            # default double-buffered weights (identical numerics).
            _SINGLE_BUFFER_WEIGHTS_OK[0] = False
            out = run(False)
    else:
        out = run(False)

    return out if B_pad == B else out[:B]


def init_params(key, d_in, d_h, d_out, dtype=jnp.float32):
    """Deterministic synthetic parameters (PyTorch-uniform-ish init)."""
    k1, k2, k3, k4 = jax.random.split(key, 4)
    lim1 = 1.0 / jnp.sqrt(d_in)
    lim2 = 1.0 / jnp.sqrt(d_h)
    w1 = jax.random.uniform(k1, (d_in, d_h), dtype, -lim1, lim1)
    b1 = jax.random.uniform(k2, (1, d_h), dtype, -lim1, lim1)
    w2 = jax.random.uniform(k3, (d_h, d_out), dtype, -lim2, lim2)
    b2 = jax.random.uniform(k4, (1, d_out), dtype, -lim2, lim2)
    return w1, b1, w2, b2


if __name__ == "__main__":
    # Representative flexnet MLP action head: Linear -> ReLU -> Linear.
    # TODO(synk): Net is a generic nn.Sequential container; arbitrary
    # user-supplied layer stacks are not auto-translated here.
    B, D_IN, D_H, D_OUT = 256, 32, 64, 16

    key = jax.random.PRNGKey(0)
    kx, kp = jax.random.split(key)
    x = jax.random.normal(kx, (B, D_IN), dtype=jnp.float32)
    w1, b1, w2, b2 = init_params(kp, D_IN, D_H, D_OUT)

    # Reference (pure JAX) Sequential forward.
    ref = jnp.maximum(x @ w1 + b1, 0.0) @ w2 + b2

    # f32 MXU path (exact).  Params laid out once, outside the forward.
    p_f32 = prepare_params(w1, b1, w2, b2)
    out_f32 = jax.block_until_ready(net_forward(x, *p_f32))
    assert out_f32.shape == (B, D_OUT)
    assert jnp.allclose(out_f32, ref, atol=1e-5, rtol=1e-5)

    # bf16-weight MXU path (valid on v5e too: its MXU is bf16-native; only the
    # epilogue needs f32 and that already runs in f32).  x stays f32 in HBM and
    # is cast to bf16 in-kernel, so no extra wrapper pass over x.
    p_bf16 = prepare_params(w1, b1, w2, b2, matmul_dtype=jnp.bfloat16)
    out_bf16 = jax.block_until_ready(net_forward(x, *p_bf16))
    assert out_bf16.shape == (B, D_OUT)
    assert jnp.allclose(out_bf16, ref, atol=5e-2, rtol=5e-2)

    print("KERNEL_OK")
</pallas_src>

<mosaic_0001>
module attributes {stable_mosaic.version = 11 : i64} {
  func.func @_mlp_kernel(%arg0: i32, %arg1: memref<256x32xf32, #tpu.memory_space<vmem>>, %arg2: memref<32x128xf32, #tpu.memory_space<vmem>>, %arg3: memref<1x128xf32, #tpu.memory_space<vmem>>, %arg4: memref<128x16xf32, #tpu.memory_space<vmem>>, %arg5: memref<1x16xf32, #tpu.memory_space<vmem>>, %arg6: memref<256x16xf32, #tpu.memory_space<vmem>>) attributes {dimension_semantics = [#tpu.dimension_semantics<parallel>], iteration_bounds = array<i64: 1>, scalar_prefetch = 0 : i64, scratch_operands = 0 : i64, tpu.core_type = #tpu.core_type<tc>, window_params = [{transform_indices = @transform_0, window_bounds = array<i64: 256, 32>}, {pipeline_mode = #tpu.pipeline_mode<synchronous>, transform_indices = @transform_1, window_bounds = array<i64: 32, 128>}, {pipeline_mode = #tpu.pipeline_mode<synchronous>, transform_indices = @transform_2, window_bounds = array<i64: 1, 128>}, {pipeline_mode = #tpu.pipeline_mode<synchronous>, transform_indices = @transform_3, window_bounds = array<i64: 128, 16>}, {pipeline_mode = #tpu.pipeline_mode<synchronous>, transform_indices = @transform_4, window_bounds = array<i64: 1, 16>}, {transform_indices = @transform_5, window_bounds = array<i64: 256, 16>}]} {
    %c0 = arith.constant 0 : index
    %c0_0 = arith.constant 0 : index
    %0 = vector.load %arg1[%c0, %c0_0] : memref<256x32xf32, #tpu.memory_space<vmem>>, vector<256x32xf32>
    %c0_1 = arith.constant 0 : index
    %c0_2 = arith.constant 0 : index
    %1 = vector.load %arg2[%c0_1, %c0_2] : memref<32x128xf32, #tpu.memory_space<vmem>>, vector<32x128xf32>
    %cst = arith.constant dense<0.000000e+00> : vector<256x128xf32>
    %2 = tpu.matmul %0, %1, %cst {dimension_numbers = #tpu.dot_dimension_numbers<[1], [0], [0], [1], [0, 0, 1, 1], [], []>} : vector<256x32xf32>, vector<32x128xf32>, vector<256x128xf32> -> vector<256x128xf32>
    %c0_3 = arith.constant 0 : index
    %c0_4 = arith.constant 0 : index
    %3 = vector.load %arg3[%c0_3, %c0_4] : memref<1x128xf32, #tpu.memory_space<vmem>>, vector<1x128xf32>
    %4 = vector.broadcast %3 : vector<1x128xf32> to vector<256x128xf32>
    %5 = arith.addf %2, %4 : vector<256x128xf32>
    %cst_5 = arith.constant 0.000000e+00 : f32
    %6 = vector.broadcast %cst_5 : f32 to vector<256x128xf32>
    %7 = arith.maximumf %5, %6 : vector<256x128xf32>
    %c0_6 = arith.constant 0 : index
    %c0_7 = arith.constant 0 : index
    %8 = vector.load %arg4[%c0_6, %c0_7] : memref<128x16xf32, #tpu.memory_space<vmem>>, vector<128x16xf32>
    %cst_8 = arith.constant dense<0.000000e+00> : vector<256x16xf32>
    %9 = tpu.matmul %7, %8, %cst_8 {dimension_numbers = #tpu.dot_dimension_numbers<[1], [0], [0], [1], [0, 0, 1, 1], [], []>} : vector<256x128xf32>, vector<128x16xf32>, vector<256x16xf32> -> vector<256x16xf32>
    %c0_9 = arith.constant 0 : index
    %c0_10 = arith.constant 0 : index
    %10 = vector.load %arg5[%c0_9, %c0_10] : memref<1x16xf32, #tpu.memory_space<vmem>>, vector<1x16xf32>
    %11 = vector.broadcast %10 : vector<1x16xf32> to vector<256x16xf32>
    %12 = arith.addf %9, %11 : vector<256x16xf32>
    %c0_11 = arith.constant 0 : index
    %c0_12 = arith.constant 0 : index
    %13 = vector.load %arg6[%c0_11, %c0_12] : memref<256x16xf32, #tpu.memory_space<vmem>>, vector<256x16xf32>
    tpu.vector_store %arg6[%c0_11, %c0_12], %12 {strides = array<i32>} : memref<256x16xf32, #tpu.memory_space<vmem>>, vector<256x16xf32>,
    return
  }
  func.func @transform_0(%arg0: i32) -> (i32, i32) {
    %c0_i32 = arith.constant 0 : i32
    %c0_i32_0 = arith.constant 0 : i32
    return %arg0, %c0_i32 : i32, i32
  }
  func.func @transform_1(%arg0: i32) -> (i32, i32) {
    %c0_i32 = arith.constant 0 : i32
    %c0_i32_0 = arith.constant 0 : i32
    %c0_i32_1 = arith.constant 0 : i32
    return %c0_i32, %c0_i32_0 : i32, i32
  }
  func.func @transform_2(%arg0: i32) -> (i32, i32) {
    %c0_i32 = arith.constant 0 : i32
    %c0_i32_0 = arith.constant 0 : i32
    %c0_i32_1 = arith.constant 0 : i32
    return %c0_i32, %c0_i32_0 : i32, i32
  }
  func.func @transform_3(%arg0: i32) -> (i32, i32) {
    %c0_i32 = arith.constant 0 : i32
    %c0_i32_0 = arith.constant 0 : i32
    %c0_i32_1 = arith.constant 0 : i32
    return %c0_i32, %c0_i32_0 : i32, i32
  }
  func.func @transform_4(%arg0: i32) -> (i32, i32) {
    %c0_i32 = arith.constant 0 : i32
    %c0_i32_0 = arith.constant 0 : i32
    %c0_i32_1 = arith.constant 0 : i32
    return %c0_i32, %c0_i32_0 : i32, i32
  }
  func.func @transform_5(%arg0: i32) -> (i32, i32) {
    %c0_i32 = arith.constant 0 : i32
    %c0_i32_0 = arith.constant 0 : i32
    return %arg0, %c0_i32 : i32, i32
  }
}

module attributes {stable_mosaic.version = 11 : i64} {
  func.func @_mlp_kernel(%arg0: i32, %arg1: memref<256x32xf32, #tpu.memory_space<vmem>>, %arg2: memref<32x128xf32, #tpu.memory_space<vmem>>, %arg3: memref<1x128xf32, #tpu.memory_space<vmem>>, %arg4: memref<128x16xf32, #tpu.memory_space<vmem>>, %arg5: memref<1x16xf32, #tpu.memory_space<vmem>>, %arg6: memref<256x16xf32, #tpu.memory_space<vmem>>) attributes {dimension_semantics = [#tpu.dimension_semantics<parallel>], iteration_bounds = array<i64: 1>, scalar_prefetch = 0 : i64, scratch_operands = 0 : i64, tpu.core_type = #tpu.core_type<tc>, window_params = [{transform_indices = @transform_0, window_bounds = array<i64: 256, 32>}, {pipeline_mode = #tpu.pipeline_mode<synchronous>, transform_indices = @transform_1, window_bounds = array<i64: 32, 128>}, {pipeline_mode = #tpu.pipeline_mode<synchronous>, transform_indices = @transform_2, window_bounds = array<i64: 1, 128>}, {pipeline_mode = #tpu.pipeline_mode<synchronous>, transform_indices = @transform_3, window_bounds = array<i64: 128, 16>}, {pipeline_mode = #tpu.pipeline_mode<synchronous>, transform_indices = @transform_4, window_bounds = array<i64: 1, 16>}, {transform_indices = @transform_5, window_bounds = array<i64: 256, 16>}]} {
    %c0 = arith.constant 0 : index
    %c0_0 = arith.constant 0 : index
    %0 = vector.load %arg1[%c0, %c0_0] : memref<256x32xf32, #tpu.memory_space<vmem>>, vector<256x32xf32>
    %c0_1 = arith.constant 0 : index
    %c0_2 = arith.constant 0 : index
    %1 = vector.load %arg2[%c0_1, %c0_2] : memref<32x128xf32, #tpu.memory_space<vmem>>, vector<32x128xf32>
    %cst = arith.constant dense<0.000000e+00> : vector<256x128xf32>
    %2 = tpu.matmul %0, %1, %cst {dimension_numbers = #tpu.dot_dimension_numbers<[1], [0], [0], [1], [0, 0, 1, 1], [], []>} : vector<256x32xf32>, vector<32x128xf32>, vector<256x128xf32> -> vector<256x128xf32>
    %c0_3 = arith.constant 0 : index
    %c0_4 = arith.constant 0 : index
    %3 = vector.load %arg3[%c0_3, %c0_4] : memref<1x128xf32, #tpu.memory_space<vmem>>, vector<1x128xf32>
    %4 = vector.broadcast %3 : vector<1x128xf32> to vector<256x128xf32>
    %5 = arith.addf %2, %4 : vector<256x128xf32>
    %cst_5 = arith.constant 0.000000e+00 : f32
    %6 = vector.broadcast %cst_5 : f32 to vector<256x128xf32>
    %7 = arith.maximumf %5, %6 : vector<256x128xf32>
    %c0_6 = arith.constant 0 : index
    %c0_7 = arith.constant 0 : index
    %8 = vector.load %arg4[%c0_6, %c0_7] : memref<128x16xf32, #tpu.memory_space<vmem>>, vector<128x16xf32>
    %cst_8 = arith.constant dense<0.000000e+00> : vector<256x16xf32>
    %9 = tpu.matmul %7, %8, %cst_8 {dimension_numbers = #tpu.dot_dimension_numbers<[1], [0], [0], [1], [0, 0, 1, 1], [], []>} : vector<256x128xf32>, vector<128x16xf32>, vector<256x16xf32> -> vector<256x16xf32>
    %c0_9 = arith.constant 0 : index
    %c0_10 = arith.constant 0 : index
    %10 = vector.load %arg5[%c0_9, %c0_10] : memref<1x16xf32, #tpu.memory_space<vmem>>, vector<1x16xf32>
    %11 = vector.broadcast %10 : vector<1x16xf32> to vector<256x16xf32>
    %12 = arith.addf %9, %11 : vector<256x16xf32>
    %c0_11 = arith.constant 0 : index
    %c0_12 = arith.constant 0 : index
    %13 = vector.load %arg6[%c0_11, %c0_12] : memref<256x16xf32, #tpu.memory_space<vmem>>, vector<256x16xf32>
    tpu.vector_store %arg6[%c0_11, %c0_12], %12 {strides = array<i32>} : memref<256x16xf32, #tpu.memory_space<vmem>>, vector<256x16xf32>,
    return
  }
  func.func @transform_0(%arg0: i32) -> (i32, i32) {
    %c0_i32 = arith.constant 0 : i32
    %c0_i32_0 = arith.constant 0 : i32
    return %arg0, %c0_i32 : i32, i32
  }
  func.func @transform_1(%arg0: i32) -> (i32, i32) {
    %c0_i32 = arith.constant 0 : i32
    %c0_i32_0 = arith.constant 0 : i32
    %c0_i32_1 = arith.constant 0 : i32
    return %c0_i32, %c0_i32_0 : i32, i32
  }
  func.func @transform_2(%arg0: i32) -> (i32, i32) {
    %c0_i32 = arith.constant 0 : i32
    %c0_i32_0 = arith.constant 0 : i32
    %c0_i32_1 = arith.constant 0 : i32
    return %c0_i32, %c0_i32_0 : i32, i32
  }
  func.func @transform_3(%arg0: i32) -> (i32, i32) {
    %c0_i32 = arith.constant 0 : i32
    %c0_i32_0 = arith.constant 0 : i32
    %c0_i32_1 = arith.constant 0 : i32
    return %c0_i32, %c0_i32_0 : i32, i32
  }
  func.func @transform_4(%arg0: i32) -> (i32, i32) {
    %c0_i32 = arith.constant 0 : i32
    %c0_i32_0 = arith.constant 0 : i32
    %c0_i32_1 = arith.constant 0 : i32
    return %c0_i32, %c0_i32_0 : i32, i32
  }
  func.func @transform_5(%arg0: i32) -> (i32, i32) {
    %c0_i32 = arith.constant 0 : i32
    %c0_i32_0 = arith.constant 0 : i32
    return %arg0, %c0_i32 : i32, i32
  }
}

</mosaic_0001>

<bundles_post_ra>
// kernel: tpu_custom_call.1
= control target key start
LH: loop header
LB: loop body
LE: loop exit
PB: predicated region body
PF: predicated region fallthrough
CT: control target
= control target key end

     0   :  { %vm63_vm0 = vcmask 261120   ;;  %vm665_vm1 = vcmask 130048   ;;  %s1408_s1 = inlined_call_operand.vmem [shape: f32[32,128], index: 1, kind: input, shape index: {}]   ;;  %s1409_s0 = inlined_call_operand.vmem [shape: f32[256,32], index: 0, kind: input, shape index: {}]   ;;  %s1410_s3 = inlined_call_operand.vmem [shape: f32[128,16], index: 3, kind: input, shape index: {}]   ;;  %s1411_s2 = inlined_call_operand.vmem [shape: f32[1,128], index: 2, kind: input, shape index: {}]   ;;  %s1412_s4 = inlined_call_operand.vmem [shape: f32[1,16], index: 4, kind: input, shape index: {}]   ;;  %s1413_s5 = inlined_call_operand.vmem [shape: f32[256,16], index: 5, kind: output, shape index: {}]  }
   0x1   :  { %v55_v0 = vld [vmem:[%s1408_s1 + $0x18] sm:$0xff]  ;;  %v54_v1 = vld [vmem:[%s1408_s1 + $0x10] sm:$0xff]  ;;  %v20_v2 = vld [vmem:[%s1409_s0] sm:$0xff] }
   0x2   :  { %820 = vmatprep.subr.mxu0 %v55_v0  ;;  %v53_v3 = vld [vmem:[%s1408_s1 + $0x8] sm:$0xff]  ;;  %828 = vmatprep.mubr.msk.f32.mxu0 %vm63_vm0, %v20_v2  ;;  %v52_v4 = vld [vmem:[%s1408_s1] sm:$0xff]  ;;  %v22_v6 = vld [vmem:[%s1409_s0 + $0x10] sm:$0xff] }
   0x3   :  { %821 = vmatpush3.msra.mxu0 %v55_v0  ;;  %v21_v5 = vld [vmem:[%s1409_s0 + $0x8] sm:$0xff]  ;;  %v23_v7 = vld [vmem:[%s1409_s0 + $0x18] sm:$0xff]  ;;  %v24_v8 = vld [vmem:[%s1409_s0 + $0x20] sm:$0xff] }
   0x4   :  { %822 = vmatprep.subr.mxu0 %v54_v1  ;;  %v432_v9 = vld [vmem:[%s1410_s3 + $0x78] sm:$0xff]  ;;  %v431_v10 = vld [vmem:[%s1410_s3 + $0x70] sm:$0xff]  ;;  %v25_v11 = vld [vmem:[%s1409_s0 + $0x28] sm:$0xff] }
   0x5   :  { %823 = vmatpush3.msra.mxu0 %v54_v1  ;;  %v430_v12 = vld [vmem:[%s1410_s3 + $0x68] sm:$0xff]  ;;  %v26_v13 = vld [vmem:[%s1409_s0 + $0x30] sm:$0xff]  ;;  %956 = vmatprep.subr.mxu1 %v432_v9  ;;  %v429_v14 = vld [vmem:[%s1410_s3 + $0x60] sm:$0xff] }
   0x6   :  { %824 = vmatprep.subr.mxu0 %v53_v3  ;;  %972 = vmatpush3.msra.mxu1 %v432_v9  ;;  %v27_v15 = vld [vmem:[%s1409_s0 + $0x38] sm:$0xff]  ;;  %v28_v17 = vld [vmem:[%s1409_s0 + $0x40] sm:$0xff]  ;;  %v427_v18 = vld [vmem:[%s1410_s3 + $0x50] sm:$0xff] }
   0x7   :  { %825 = vmatpush3.msra.mxu0 %v53_v3  ;;  %v428_v16 = vld [vmem:[%s1410_s3 + $0x58] sm:$0xff]  ;;  %957 = vmatprep.subr.mxu1 %v431_v10  ;;  %v29_v19 = vld [vmem:[%s1409_s0 + $0x48] sm:$0xff]  ;;  %v30_v21 = vld [vmem:[%s1409_s0 + $0x50] sm:$0xff] }
   0x8   :  { %826 = vmatprep.subr.mxu0 %v52_v4  ;;  %973 = vmatpush3.msra.mxu1 %v431_v10  ;;  %v426_v20 = vld [vmem:[%s1410_s3 + $0x48] sm:$0xff]  ;;  %v425_v22 = vld [vmem:[%s1410_s3 + $0x40] sm:$0xff]  ;;  %v31_v23 = vld [vmem:[%s1409_s0 + $0x58] sm:$0xff] }
   0x9   :  { %827 = vmatpush3.msra.mxu0 %v52_v4  ;;  %958 = vmatprep.subr.mxu1 %v430_v12  ;;  %v424_v24 = vld [vmem:[%s1410_s3 + $0x38] sm:$0xff]  ;;  %v32_v25 = vld [vmem:[%s1409_s0 + $0x60] sm:$0xff]  ;;  %v423_v26 = vld [vmem:[%s1410_s3 + $0x30] sm:$0xff] }
   0xa   :  { %829 = vmatmul.mubr.msk.f32.vlgmr.msra.gmra.mxu0 %vm63_vm0, %v21_v5  ;;  %876 = vmatprep.subr.mxu0 %v432_v9  ;;  %v33_v27 = vld [vmem:[%s1409_s0 + $0x68] sm:$0xff]  ;;  %v34_v29 = vld [vmem:[%s1409_s0 + $0x70] sm:$0xff]  ;;  %v421_v30 = vld [vmem:[%s1410_s3 + $0x20] sm:$0xff] }
   0xb   :  { %831 = vmatprep.mubr.msk.f32.mxu0 %vm63_vm0, %v22_v6  ;;  %877 = vmatpush3.msra.mxu0 %v432_v9  ;;  %v422_v28 = vld [vmem:[%s1410_s3 + $0x28] sm:$0xff]  ;;  %v35_v31 = vld [vmem:[%s1409_s0 + $0x78] sm:$0xff]  ;;  %v36_v32 = vld [vmem:[%s1409_s0 + $0x80] sm:$0xff] }
   0xc   :  { %878 = vmatprep.subr.mxu0 %v431_v10  ;;  %974 = vmatpush3.msra.mxu1 %v430_v12  ;;  %v37_v33 = vld [vmem:[%s1409_s0 + $0x88] sm:$0xff]  ;;  %v38_v34 = vld [vmem:[%s1409_s0 + $0x90] sm:$0xff]  ;;  %v39_v35 = vld [vmem:[%s1409_s0 + $0x98] sm:$0xff] }
   0xd   :  { %879 = vmatpush3.msra.mxu0 %v431_v10  ;;  %959 = vmatprep.subr.mxu1 %v429_v14  ;;  %v40_v36 = vld [vmem:[%s1409_s0 + $0xa0] sm:$0xff]  ;;  %v41_v37 = vld [vmem:[%s1409_s0 + $0xa8] sm:$0xff]  ;;  %v42_v38 = vld [vmem:[%s1409_s0 + $0xb0] sm:$0xff] }
   0xe   :  { %832 = vmatmul.mubr.msk.f32.gmra.mxu0 %vm63_vm0, %v23_v7  ;;  %880 = vmatprep.subr.mxu0 %v430_v12  ;;  %v43_v39 = vld [vmem:[%s1409_s0 + $0xb8] sm:$0xff]  ;;  %v44_v40 = vld [vmem:[%s1409_s0 + $0xc0] sm:$0xff]  ;;  %v45_v41 = vld [vmem:[%s1409_s0 + $0xc8] sm:$0xff] }
   0xf   :  { %834 = vmatprep.mubr.msk.f32.mxu0 %vm63_vm0, %v24_v8  ;;  %881 = vmatpush3.msra.mxu0 %v430_v12  ;;  %v46_v42 = vld [vmem:[%s1409_s0 + $0xd0] sm:$0xff]  ;;  %v47_v43 = vld [vmem:[%s1409_s0 + $0xd8] sm:$0xff]  ;;  %v48_v44 = vld [vmem:[%s1409_s0 + $0xe0] sm:$0xff] }
  0x10   :  { %882 = vmatprep.subr.mxu0 %v429_v14  ;;  %975 = vmatpush3.msra.mxu1 %v429_v14  ;;  %v49_v45 = vld [vmem:[%s1409_s0 + $0xe8] sm:$0xff]  ;;  %v50_v46 = vld [vmem:[%s1409_s0 + $0xf0] sm:$0xff]  ;;  %v51_v47 = vld [vmem:[%s1409_s0 + $0xf8] sm:$0xff] }
  0x11   :  { %883 = vmatpush3.msra.mxu0 %v429_v14  ;;  %960 = vmatprep.subr.mxu1 %v428_v16  ;;  %v420_v48 = vld [vmem:[%s1410_s3 + $0x18] sm:$0xff]  ;;  %v419_v49 = vld [vmem:[%s1410_s3 + $0x10] sm:$0xff]  ;;  %v418_v50 = vld [vmem:[%s1410_s3 + $0x8] sm:$0xff] }
  0x12   :  { %835 = vmatmul.mubr.msk.f32.gmra.mxu0 %vm63_vm0, %v25_v11  ;;  %884 = vmatprep.subr.mxu0 %v428_v16  ;;  %v417_v51 = vld [vmem:[%s1410_s3] sm:$0xff] }
  0x13   :  { %837 = vmatprep.mubr.msk.f32.mxu0 %vm63_vm0, %v26_v13  ;;  %885 = vmatpush3.msra.mxu0 %v428_v16  ;;  %v1209_v52 = vld [vmem:[%s1411_s2] ss:$0 sm:$0xff] }
  0x14   :  { %886 = vmatprep.subr.mxu0 %v427_v18  ;;  %976 = vmatpush3.msra.mxu1 %v428_v16 }
  0x15   :  { %887 = vmatpush3.msra.mxu0 %v427_v18  ;;  %961 = vmatprep.subr.mxu1 %v427_v18 }
  0x16   :  { %838 = vmatmul.mubr.msk.f32.gmra.mxu0 %vm63_vm0, %v27_v15  ;;  %888 = vmatprep.subr.mxu0 %v426_v20 }
  0x17   :  { %840 = vmatprep.mubr.msk.f32.mxu0 %vm63_vm0, %v28_v17  ;;  %889 = vmatpush3.msra.mxu0 %v426_v20 }
  0x18   :  { %890 = vmatprep.subr.mxu0 %v425_v22  ;;  %977 = vmatpush3.msra.mxu1 %v427_v18 }
  0x19   :  { %891 = vmatpush3.msra.mxu0 %v425_v22  ;;  %962 = vmatprep.subr.mxu1 %v426_v20 }
  0x1a   :  { %841 = vmatmul.mubr.msk.f32.gmra.mxu0 %vm63_vm0, %v29_v19  ;;  %892 = vmatprep.subr.mxu0 %v424_v24 }
  0x1b   :  { %843 = vmatprep.mubr.msk.f32.mxu0 %vm63_vm0, %v30_v21  ;;  %893 = vmatpush3.msra.mxu0 %v424_v24 }
  0x1c   :  { %894 = vmatprep.subr.mxu0 %v423_v26  ;;  %978 = vmatpush3.msra.mxu1 %v426_v20 }
  0x1d   :  { %895 = vmatpush3.msra.mxu0 %v423_v26  ;;  %963 = vmatprep.subr.mxu1 %v425_v22 }
  0x1e   :  { %844 = vmatmul.mubr.msk.f32.gmra.mxu0 %vm63_vm0, %v31_v23  ;;  %896 = vmatprep.subr.mxu0 %v422_v28 }
  0x1f   :  { %846 = vmatprep.mubr.msk.f32.mxu0 %vm63_vm0, %v32_v25  ;;  %897 = vmatpush3.msra.mxu0 %v422_v28 }
  0x20   :  { %898 = vmatprep.subr.mxu0 %v421_v30  ;;  %979 = vmatpush3.msra.mxu1 %v425_v22 }
  0x21   :  { %899 = vmatpush3.msra.mxu0 %v421_v30  ;;  %964 = vmatprep.subr.mxu1 %v424_v24 }
  0x22   :  { %847 = vmatmul.mubr.msk.f32.gmra.mxu0 %vm63_vm0, %v33_v27  ;;  %980 = vmatpush3.msra.mxu1 %v424_v24 }
  0x23   :  { %849 = vmatprep.mubr.msk.f32.mxu0 %vm63_vm0, %v34_v29  ;;  %965 = vmatprep.subr.mxu1 %v423_v26 }
  0x24   :  { %981 = vmatpush3.msra.mxu1 %v423_v26  ;;  %900 = vmatprep.subr.mxu0 %v420_v48 }
  0x25   :  { %966 = vmatprep.subr.mxu1 %v422_v28  ;;  %901 = vmatpush3.msra.mxu0 %v420_v48 }
  0x26   :  { %850 = vmatmul.mubr.msk.f32.gmra.mxu0 %vm63_vm0, %v35_v31  ;;  %982 = vmatpush3.msra.mxu1 %v422_v28 }
  0x27   :  { %852 = vmatprep.mubr.msk.f32.mxu0 %vm63_vm0, %v36_v32  ;;  %967 = vmatprep.subr.mxu1 %v421_v30 }
  0x28   :  { %983 = vmatpush3.msra.mxu1 %v421_v30  ;;  %902 = vmatprep.subr.mxu0 %v419_v49 }
  0x29   :  { %968 = vmatprep.subr.mxu1 %v420_v48  ;;  %903 = vmatpush3.msra.mxu0 %v419_v49 }
  0x2a   :  { %853 = vmatmul.mubr.msk.f32.gmra.mxu0 %vm63_vm0, %v37_v33  ;;  %984 = vmatpush3.msra.mxu1 %v420_v48 }
  0x2b   :  { %855 = vmatprep.mubr.msk.f32.mxu0 %vm63_vm0, %v38_v34  ;;  %969 = vmatprep.subr.mxu1 %v419_v49 }
  0x2c   :  { %985 = vmatpush3.msra.mxu1 %v419_v49  ;;  %904 = vmatprep.subr.mxu0 %v418_v50 }
  0x2d   :  { %970 = vmatprep.subr.mxu1 %v418_v50  ;;  %905 = vmatpush3.msra.mxu0 %v418_v50 }
  0x2e   :  { %856 = vmatmul.mubr.msk.f32.gmra.mxu0 %vm63_vm0, %v39_v35  ;;  %986 = vmatpush3.msra.mxu1 %v418_v50 }
  0x2f   :  { %858 = vmatprep.mubr.msk.f32.mxu0 %vm63_vm0, %v40_v36  ;;  %906 = vmatprep.subr.mxu0 %v417_v51 }
  0x30   :  { %971 = vmatprep.subr.mxu1 %v417_v51  ;;  %907 = vmatpush3.msra.mxu0 %v417_v51 }
  0x31   :  { %987 = vmatpush3.msra.mxu1 %v417_v51 }
  0x32   :  { %859 = vmatmul.mubr.msk.f32.gmra.mxu0 %vm63_vm0, %v41_v37 }
  0x33   :  { %861 = vmatprep.mubr.msk.f32.mxu0 %vm63_vm0, %v42_v38 }
  0x36   :  { %862 = vmatmul.mubr.msk.f32.gmra.mxu0 %vm63_vm0, %v43_v39 }
  0x37   :  { %864 = vmatprep.mubr.msk.f32.mxu0 %vm63_vm0, %v44_v40 }
  0x3a   :  { %865 = vmatmul.mubr.msk.f32.gmra.mxu0 %vm63_vm0, %v45_v41 }
  0x3b   :  { %867 = vmatprep.mubr.msk.f32.mxu0 %vm63_vm0, %v46_v42 }
  0x3e   :  { %868 = vmatmul.mubr.msk.f32.gmra.mxu0 %vm63_vm0, %v47_v43 }
  0x3f   :  { %870 = vmatprep.mubr.msk.f32.mxu0 %vm63_vm0, %v48_v44 }
  0x42   :  { %871 = vmatmul.mubr.msk.f32.gmra.mxu0 %vm63_vm0, %v49_v45 }
  0x43   :  { %873 = vmatprep.mubr.msk.f32.mxu0 %vm63_vm0, %v50_v46 }
  0x46   :  { %874 = vmatmul.mubr.msk.f32.gmra.mxu0 %vm63_vm0, %v51_v47 }
  0xca   :  { %v830_v53 = vpop.f32.mrf.mxu0 }
  0xcb   :  { %v232_v54 = vadd.f32 %v830_v53, %v1209_v52 }
  0xcc   :  { %v226_v55 = vpop.f32.mrf.mxu0 }
  0xcd   :  { %v227_v56 = vadd.f32 %v1209_v52, %v226_v55  ;;  %v386_v59 = vmax.f32 %v232_v54, 0.0 }
  0xce   :  { %v833_v57 = vpop.f32.mrf.mxu0 }
  0xcf   :  { %v385_v58 = vmax.f32 %v227_v56, 0.0  ;;  %v242_v60 = vadd.f32 %v833_v57, %v1209_v52 }
  0xd0   :  { %v236_v61 = vpop.f32.mrf.mxu0 }
  0xd1   :  { %v237_v62 = vadd.f32 %v1209_v52, %v236_v61  ;;  %908 = vmatprep.mubr.f32.mxu0 %v385_v58  ;;  %v388_v1 = vmax.f32 %v242_v60, 0.0 }
  0xd2   :  { %v836_v63 = vpop.f32.mrf.mxu0  ;;  %909 = vmatmul.mubr.f32.vlgmr.msra.gmra.mxu0 %v386_v59 }
  0xd3   :  { %v387_v0 = vmax.f32 %v237_v62, 0.0  ;;  %v252_v2 = vadd.f32 %v836_v63, %v1209_v52 }
  0xd4   :  { %v246_v3 = vpop.f32.mrf.mxu0 }
  0xd5   :  { %v247_v4 = vadd.f32 %v1209_v52, %v246_v3  ;;  %911 = vmatprep.mubr.f32.mxu0 %v387_v0  ;;  %v390_v7 = vmax.f32 %v252_v2, 0.0 }
  0xd6   :  { %v839_v5 = vpop.f32.mrf.mxu0  ;;  %912 = vmatmul.mubr.f32.gmra.mxu0 %v388_v1 }
  0xd7   :  { %v389_v6 = vmax.f32 %v247_v4, 0.0  ;;  %v262_v8 = vadd.f32 %v839_v5, %v1209_v52 }
  0xd8   :  { %v256_v9 = vpop.f32.mrf.mxu0 }
  0xd9   :  { %914 = vmatprep.mubr.f32.mxu0 %v389_v6  ;;  %v257_v10 = vadd.f32 %v1209_v52, %v256_v9  ;;  %v392_v13 = vmax.f32 %v262_v8, 0.0 }
  0xda   :  { %v842_v11 = vpop.f32.mrf.mxu0  ;;  %915 = vmatmul.mubr.f32.gmra.mxu0 %v390_v7 }
  0xdb   :  { %v391_v12 = vmax.f32 %v257_v10, 0.0  ;;  %v272_v14 = vadd.f32 %v842_v11, %v1209_v52 }
  0xdc   :  { %v266_v15 = vpop.f32.mrf.mxu0 }
  0xdd   :  { %v267_v16 = vadd.f32 %v1209_v52, %v266_v15  ;;  %917 = vmatprep.mubr.f32.mxu1 %v391_v12  ;;  %v394_v19 = vmax.f32 %v272_v14, 0.0 }
  0xde   :  { %v845_v17 = vpop.f32.mrf.mxu0  ;;  %918 = vmatmul.mubr.f32.vlgmr.msra.gmra.mxu1 %v392_v13 }
  0xdf   :  { %v393_v18 = vmax.f32 %v267_v16, 0.0  ;;  %v282_v20 = vadd.f32 %v845_v17, %v1209_v52 }
  0xe0   :  { %v276_v21 = vpop.f32.mrf.mxu0 }
  0xe1   :  { %v277_v22 = vadd.f32 %v1209_v52, %v276_v21  ;;  %920 = vmatprep.mubr.f32.mxu1 %v393_v18  ;;  %v396_v25 = vmax.f32 %v282_v20, 0.0 }
  0xe2   :  { %v848_v23 = vpop.f32.mrf.mxu0  ;;  %921 = vmatmul.mubr.f32.gmra.mxu1 %v394_v19 }
  0xe3   :  { %v395_v24 = vmax.f32 %v277_v22, 0.0  ;;  %v292_v26 = vadd.f32 %v848_v23, %v1209_v52  ;;  %v1246_v22 = vld [vmem:[%s1412_s4] ss:$0 sm:$0xff] }
  0xe4   :  { %v286_v27 = vpop.f32.mrf.mxu0 }
  0xe5   :  { %v287_v28 = vadd.f32 %v1209_v52, %v286_v27  ;;  %923 = vmatprep.mubr.f32.mxu1 %v395_v24  ;;  %v398_v31 = vmax.f32 %v292_v26, 0.0 }
  0xe6   :  { %v851_v29 = vpop.f32.mrf.mxu0  ;;  %924 = vmatmul.mubr.f32.gmra.mxu1 %v396_v25 }
  0xe7   :  { %v397_v30 = vmax.f32 %v287_v28, 0.0  ;;  %v302_v32 = vadd.f32 %v851_v29, %v1209_v52 }
  0xe8   :  { %v296_v33 = vpop.f32.mrf.mxu0 }
  0xe9   :  { %v297_v34 = vadd.f32 %v1209_v52, %v296_v33  ;;  %926 = vmatprep.mubr.f32.mxu1 %v397_v30  ;;  %v400_v37 = vmax.f32 %v302_v32, 0.0 }
  0xea   :  { %v854_v35 = vpop.f32.mrf.mxu0  ;;  %927 = vmatmul.mubr.f32.gmra.mxu1 %v398_v31 }
  0xeb   :  { %v399_v36 = vmax.f32 %v297_v34, 0.0  ;;  %v312_v38 = vadd.f32 %v854_v35, %v1209_v52 }
  0xec   :  { %v306_v39 = vpop.f32.mrf.mxu0 }
  0xed   :  { %v307_v40 = vadd.f32 %v1209_v52, %v306_v39  ;;  %929 = vmatprep.mubr.f32.mxu1 %v399_v36  ;;  %v402_v43 = vmax.f32 %v312_v38, 0.0 }
  0xee   :  { %v857_v41 = vpop.f32.mrf.mxu0  ;;  %930 = vmatmul.mubr.f32.gmra.mxu1 %v400_v37 }
  0xef   :  { %v401_v42 = vmax.f32 %v307_v40, 0.0  ;;  %v322_v44 = vadd.f32 %v857_v41, %v1209_v52 }
  0xf0   :  { %v316_v45 = vpop.f32.mrf.mxu0 }
  0xf1   :  { %v317_v46 = vadd.f32 %v1209_v52, %v316_v45  ;;  %932 = vmatprep.mubr.f32.mxu1 %v401_v42  ;;  %v404_v49 = vmax.f32 %v322_v44, 0.0 }
  0xf2   :  { %v860_v47 = vpop.f32.mrf.mxu0  ;;  %933 = vmatmul.mubr.f32.gmra.mxu1 %v402_v43 }
  0xf3   :  { %v403_v48 = vmax.f32 %v317_v46, 0.0  ;;  %v332_v50 = vadd.f32 %v860_v47, %v1209_v52 }
  0xf4   :  { %v326_v51 = vpop.f32.mrf.mxu0 }
  0xf5   :  { %v327_v53 = vadd.f32 %v1209_v52, %v326_v51  ;;  %935 = vmatprep.mubr.f32.mxu1 %v403_v48  ;;  %v406_v56 = vmax.f32 %v332_v50, 0.0 }
  0xf6   :  { %v863_v54 = vpop.f32.mrf.mxu0  ;;  %936 = vmatmul.mubr.f32.gmra.mxu1 %v404_v49 }
  0xf7   :  { %v405_v55 = vmax.f32 %v327_v53, 0.0  ;;  %v342_v57 = vadd.f32 %v863_v54, %v1209_v52 }
  0xf8   :  { %v336_v58 = vpop.f32.mrf.mxu0 }
  0xf9   :  { %v337_v59 = vadd.f32 %v1209_v52, %v336_v58  ;;  %938 = vmatprep.mubr.f32.mxu1 %v405_v55  ;;  %v408_v62 = vmax.f32 %v342_v57, 0.0 }
  0xfa   :  { %v866_v60 = vpop.f32.mrf.mxu0  ;;  %939 = vmatmul.mubr.f32.gmra.mxu1 %v406_v56 }
  0xfb   :  { %v407_v61 = vmax.f32 %v337_v59, 0.0  ;;  %v352_v63 = vadd.f32 %v866_v60, %v1209_v52 }
  0xfc   :  { %v346_v0 = vpop.f32.mrf.mxu0 }
  0xfd   :  { %v347_v1 = vadd.f32 %v1209_v52, %v346_v0  ;;  %941 = vmatprep.mubr.f32.mxu1 %v407_v61  ;;  %v410_v4 = vmax.f32 %v352_v63, 0.0 }
  0xfe   :  { %v869_v2 = vpop.f32.mrf.mxu0  ;;  %942 = vmatmul.mubr.f32.gmra.mxu1 %v408_v62 }
  0xff   :  { %v409_v3 = vmax.f32 %v347_v1, 0.0  ;;  %v362_v5 = vadd.f32 %v869_v2, %v1209_v52 }
 0x100   :  { %v356_v6 = vpop.f32.mrf.mxu0 }
 0x101   :  { %v357_v7 = vadd.f32 %v1209_v52, %v356_v6  ;;  %944 = vmatprep.mubr.f32.mxu1 %v409_v3  ;;  %v412_v10 = vmax.f32 %v362_v5, 0.0 }
 0x102   :  { %v872_v8 = vpop.f32.mrf.mxu0  ;;  %945 = vmatmul.mubr.f32.gmra.mxu1 %v410_v4 }
 0x103   :  { %v411_v9 = vmax.f32 %v357_v7, 0.0  ;;  %v372_v11 = vadd.f32 %v872_v8, %v1209_v52 }
 0x104   :  { %v366_v12 = vpop.f32.mrf.mxu0 }
 0x105   :  { %v367_v13 = vadd.f32 %v1209_v52, %v366_v12  ;;  %947 = vmatprep.mubr.f32.mxu1 %v411_v9  ;;  %v414_v16 = vmax.f32 %v372_v11, 0.0 }
 0x106   :  { %v875_v14 = vpop.f32.mrf.mxu0  ;;  %948 = vmatmul.mubr.f32.gmra.mxu1 %v412_v10 }
 0x107   :  { %v413_v15 = vmax.f32 %v367_v13, 0.0  ;;  %v382_v17 = vadd.f32 %v875_v14, %v1209_v52 }
 0x108   :  { %v376_v18 = vpop.f32.mrf.mxu0 }
 0x109   :  { %v377_v19 = vadd.f32 %v1209_v52, %v376_v18  ;;  %950 = vmatprep.mubr.f32.mxu1 %v413_v15  ;;  %v416_v21 = vmax.f32 %v382_v17, 0.0 }
 0x10a   :  { %951 = vmatmul.mubr.f32.gmra.mxu1 %v414_v16 }
 0x10b   :  { %v415_v20 = vmax.f32 %v377_v19, 0.0 }
 0x10d   :  { %953 = vmatprep.mubr.f32.mxu1 %v415_v20 }
 0x10e   :  { %954 = vmatmul.mubr.f32.gmra.mxu1 %v416_v21 }
 0x192   :  { %v910_v23 = vpop.f32.mrf.mxu0 }
 0x193   :  { %v512_v24 = vadd.f32 %v910_v23, %v1246_v22 }
 0x194   :  { %v506_v25 = vpop.f32.mrf.mxu0 }
 0x195   :  { %667 = vst.msk [vmem:[%s1413_s5 + $0x8] sm:$0xff] %vm665_vm1, %v512_v24  ;;  %v507_v52 = vadd.f32 %v1246_v22, %v506_v25 }
 0x196   :  { %v913_v26 = vpop.f32.mrf.mxu0 }
 0x197   :  { %666 = vst.msk [vmem:[%s1413_s5] sm:$0xff] %vm665_vm1, %v507_v52  ;;  %v522_v27 = vadd.f32 %v913_v26, %v1246_v22 }
 0x198   :  { %v516_v28 = vpop.f32.mrf.mxu0 }
 0x199   :  { %669 = vst.msk [vmem:[%s1413_s5 + $0x18] sm:$0xff] %vm665_vm1, %v522_v27  ;;  %v517_v29 = vadd.f32 %v1246_v22, %v516_v28 }
 0x19a   :  { %v916_v30 = vpop.f32.mrf.mxu0 }
 0x19b   :  { %668 = vst.msk [vmem:[%s1413_s5 + $0x10] sm:$0xff] %vm665_vm1, %v517_v29  ;;  %v532_v31 = vadd.f32 %v916_v30, %v1246_v22 }
 0x19c   :  { %v526_v32 = vpop.f32.mrf.mxu0 }
 0x19d   :  { %671 = vst.msk [vmem:[%s1413_s5 + $0x28] sm:$0xff] %vm665_vm1, %v532_v31  ;;  %v527_v33 = vadd.f32 %v1246_v22, %v526_v32 }
 0x19e   :  { %v919_v34 = vpop.f32.mrf.mxu1 }
 0x19f   :  { %670 = vst.msk [vmem:[%s1413_s5 + $0x20] sm:$0xff] %vm665_vm1, %v527_v33  ;;  %v542_v35 = vadd.f32 %v919_v34, %v1246_v22 }
 0x1a0   :  { %v536_v36 = vpop.f32.mrf.mxu1 }
 0x1a1   :  { %673 = vst.msk [vmem:[%s1413_s5 + $0x38] sm:$0xff] %vm665_vm1, %v542_v35  ;;  %v537_v37 = vadd.f32 %v1246_v22, %v536_v36 }
 0x1a2   :  { %v922_v38 = vpop.f32.mrf.mxu1 }
 0x1a3   :  { %672 = vst.msk [vmem:[%s1413_s5 + $0x30] sm:$0xff] %vm665_vm1, %v537_v37  ;;  %v552_v39 = vadd.f32 %v922_v38, %v1246_v22 }
 0x1a4   :  { %v546_v40 = vpop.f32.mrf.mxu1 }
 0x1a5   :  { %675 = vst.msk [vmem:[%s1413_s5 + $0x48] sm:$0xff] %vm665_vm1, %v552_v39  ;;  %v547_v41 = vadd.f32 %v1246_v22, %v546_v40 }
 0x1a6   :  { %v925_v42 = vpop.f32.mrf.mxu1 }
 0x1a7   :  { %674 = vst.msk [vmem:[%s1413_s5 + $0x40] sm:$0xff] %vm665_vm1, %v547_v41  ;;  %v562_v43 = vadd.f32 %v925_v42, %v1246_v22 }
 0x1a8   :  { %v556_v44 = vpop.f32.mrf.mxu1 }
 0x1a9   :  { %677 = vst.msk [vmem:[%s1413_s5 + $0x58] sm:$0xff] %vm665_vm1, %v562_v43  ;;  %v557_v45 = vadd.f32 %v1246_v22, %v556_v44 }
 0x1aa   :  { %v928_v46 = vpop.f32.mrf.mxu1 }
 0x1ab   :  { %676 = vst.msk [vmem:[%s1413_s5 + $0x50] sm:$0xff] %vm665_vm1, %v557_v45  ;;  %v572_v47 = vadd.f32 %v928_v46, %v1246_v22 }
 0x1ac   :  { %v566_v48 = vpop.f32.mrf.mxu1 }
 0x1ad   :  { %679 = vst.msk [vmem:[%s1413_s5 + $0x68] sm:$0xff] %vm665_vm1, %v572_v47  ;;  %v567_v49 = vadd.f32 %v1246_v22, %v566_v48 }
 0x1ae   :  { %v931_v50 = vpop.f32.mrf.mxu1 }
 0x1af   :  { %678 = vst.msk [vmem:[%s1413_s5 + $0x60] sm:$0xff] %vm665_vm1, %v567_v49  ;;  %v582_v51 = vadd.f32 %v931_v50, %v1246_v22 }
 0x1b0   :  { %v576_v53 = vpop.f32.mrf.mxu1 }
 0x1b1   :  { %681 = vst.msk [vmem:[%s1413_s5 + $0x78] sm:$0xff] %vm665_vm1, %v582_v51  ;;  %v577_v54 = vadd.f32 %v1246_v22, %v576_v53 }
 0x1b2   :  { %v934_v55 = vpop.f32.mrf.mxu1 }
 0x1b3   :  { %680 = vst.msk [vmem:[%s1413_s5 + $0x70] sm:$0xff] %vm665_vm1, %v577_v54  ;;  %v592_v56 = vadd.f32 %v934_v55, %v1246_v22 }
 0x1b4   :  { %v586_v57 = vpop.f32.mrf.mxu1 }
 0x1b5   :  { %683 = vst.msk [vmem:[%s1413_s5 + $0x88] sm:$0xff] %vm665_vm1, %v592_v56  ;;  %v587_v58 = vadd.f32 %v1246_v22, %v586_v57 }
 0x1b6   :  { %v937_v59 = vpop.f32.mrf.mxu1 }
 0x1b7   :  { %682 = vst.msk [vmem:[%s1413_s5 + $0x80] sm:$0xff] %vm665_vm1, %v587_v58  ;;  %v602_v60 = vadd.f32 %v937_v59, %v1246_v22 }
 0x1b8   :  { %v596_v61 = vpop.f32.mrf.mxu1 }
 0x1b9   :  { %685 = vst.msk [vmem:[%s1413_s5 + $0x98] sm:$0xff] %vm665_vm1, %v602_v60  ;;  %v597_v62 = vadd.f32 %v1246_v22, %v596_v61 }
 0x1ba   :  { %v940_v63 = vpop.f32.mrf.mxu1 }
 0x1bb   :  { %684 = vst.msk [vmem:[%s1413_s5 + $0x90] sm:$0xff] %vm665_vm1, %v597_v62  ;;  %v612_v0 = vadd.f32 %v940_v63, %v1246_v22 }
 0x1bc   :  { %v606_v1 = vpop.f32.mrf.mxu1 }
 0x1bd   :  { %687 = vst.msk [vmem:[%s1413_s5 + $0xa8] sm:$0xff] %vm665_vm1, %v612_v0  ;;  %v607_v2 = vadd.f32 %v1246_v22, %v606_v1 }
 0x1be   :  { %v943_v3 = vpop.f32.mrf.mxu1 }
 0x1bf   :  { %686 = vst.msk [vmem:[%s1413_s5 + $0xa0] sm:$0xff] %vm665_vm1, %v607_v2  ;;  %v622_v4 = vadd.f32 %v943_v3, %v1246_v22 }
 0x1c0   :  { %v616_v5 = vpop.f32.mrf.mxu1 }
 0x1c1   :  { %689 = vst.msk [vmem:[%s1413_s5 + $0xb8] sm:$0xff] %vm665_vm1, %v622_v4  ;;  %v617_v6 = vadd.f32 %v1246_v22, %v616_v5 }
 0x1c2   :  { %v946_v7 = vpop.f32.mrf.mxu1 }
 0x1c3   :  { %688 = vst.msk [vmem:[%s1413_s5 + $0xb0] sm:$0xff] %vm665_vm1, %v617_v6  ;;  %v632_v8 = vadd.f32 %v946_v7, %v1246_v22 }
 0x1c4   :  { %v626_v9 = vpop.f32.mrf.mxu1 }
 0x1c5   :  { %691 = vst.msk [vmem:[%s1413_s5 + $0xc8] sm:$0xff] %vm665_vm1, %v632_v8  ;;  %v627_v10 = vadd.f32 %v1246_v22, %v626_v9 }
 0x1c6   :  { %v949_v11 = vpop.f32.mrf.mxu1 }
 0x1c7   :  { %690 = vst.msk [vmem:[%s1413_s5 + $0xc0] sm:$0xff] %vm665_vm1, %v627_v10  ;;  %v642_v12 = vadd.f32 %v949_v11, %v1246_v22 }
 0x1c8   :  { %v636_v13 = vpop.f32.mrf.mxu1 }
 0x1c9   :  { %693 = vst.msk [vmem:[%s1413_s5 + $0xd8] sm:$0xff] %vm665_vm1, %v642_v12  ;;  %v637_v14 = vadd.f32 %v1246_v22, %v636_v13 }
 0x1ca   :  { %v952_v15 = vpop.f32.mrf.mxu1 }
 0x1cb   :  { %692 = vst.msk [vmem:[%s1413_s5 + $0xd0] sm:$0xff] %vm665_vm1, %v637_v14  ;;  %v652_v16 = vadd.f32 %v952_v15, %v1246_v22 }
 0x1cc   :  { %v646_v17 = vpop.f32.mrf.mxu1 }
 0x1cd   :  { %695 = vst.msk [vmem:[%s1413_s5 + $0xe8] sm:$0xff] %vm665_vm1, %v652_v16  ;;  %v647_v18 = vadd.f32 %v1246_v22, %v646_v17 }
 0x1ce   :  { %v955_v19 = vpop.f32.mrf.mxu1 }
 0x1cf   :  { %694 = vst.msk [vmem:[%s1413_s5 + $0xe0] sm:$0xff] %vm665_vm1, %v647_v18  ;;  %v662_v20 = vadd.f32 %v955_v19, %v1246_v22 }
 0x1d0   :  { %v656_v21 = vpop.f32.mrf.mxu1 }
 0x1d1   :  { %697 = vst.msk [vmem:[%s1413_s5 + $0xf8] sm:$0xff] %vm665_vm1, %v662_v20  ;;  %v657_v23 = vadd.f32 %v1246_v22, %v656_v21 }
 0x1d3   :  { %696 = vst.msk [vmem:[%s1413_s5 + $0xf0] sm:$0xff] %vm665_vm1, %v657_v23 }

// kernel: tpu_custom_call.1
= control target key start
LH: loop header
LB: loop body
LE: loop exit
PB: predicated region body
PF: predicated region fallthrough
CT: control target
= control target key end

     0   :  { %vm63_vm0 = vcmask 261120   ;;  %vm665_vm1 = vcmask 130048   ;;  %s1408_s1 = inlined_call_operand.vmem [shape: f32[32,128], index: 1, kind: input, shape index: {}]   ;;  %s1409_s0 = inlined_call_operand.vmem [shape: f32[256,32], index: 0, kind: input, shape index: {}]   ;;  %s1410_s3 = inlined_call_operand.vmem [shape: f32[128,16], index: 3, kind: input, shape index: {}]   ;;  %s1411_s2 = inlined_call_operand.vmem [shape: f32[1,128], index: 2, kind: input, shape index: {}]   ;;  %s1412_s4 = inlined_call_operand.vmem [shape: f32[1,16], index: 4, kind: input, shape index: {}]   ;;  %s1413_s5 = inlined_call_operand.vmem [shape: f32[256,16], index: 5, kind: output, shape index: {}]  }
   0x1   :  { %v55_v0 = vld [vmem:[%s1408_s1 + $0x18] sm:$0xff]  ;;  %v54_v1 = vld [vmem:[%s1408_s1 + $0x10] sm:$0xff]  ;;  %v20_v2 = vld [vmem:[%s1409_s0] sm:$0xff] }
   0x2   :  { %820 = vmatprep.subr.mxu0 %v55_v0  ;;  %v53_v3 = vld [vmem:[%s1408_s1 + $0x8] sm:$0xff]  ;;  %828 = vmatprep.mubr.msk.f32.mxu0 %vm63_vm0, %v20_v2  ;;  %v52_v4 = vld [vmem:[%s1408_s1] sm:$0xff]  ;;  %v22_v6 = vld [vmem:[%s1409_s0 + $0x10] sm:$0xff] }
   0x3   :  { %821 = vmatpush3.msra.mxu0 %v55_v0  ;;  %v21_v5 = vld [vmem:[%s1409_s0 + $0x8] sm:$0xff]  ;;  %v23_v7 = vld [vmem:[%s1409_s0 + $0x18] sm:$0xff]  ;;  %v24_v8 = vld [vmem:[%s1409_s0 + $0x20] sm:$0xff] }
   0x4   :  { %822 = vmatprep.subr.mxu0 %v54_v1  ;;  %v432_v9 = vld [vmem:[%s1410_s3 + $0x78] sm:$0xff]  ;;  %v431_v10 = vld [vmem:[%s1410_s3 + $0x70] sm:$0xff]  ;;  %v25_v11 = vld [vmem:[%s1409_s0 + $0x28] sm:$0xff] }
   0x5   :  { %823 = vmatpush3.msra.mxu0 %v54_v1  ;;  %v430_v12 = vld [vmem:[%s1410_s3 + $0x68] sm:$0xff]  ;;  %v26_v13 = vld [vmem:[%s1409_s0 + $0x30] sm:$0xff]  ;;  %956 = vmatprep.subr.mxu1 %v432_v9  ;;  %v429_v14 = vld [vmem:[%s1410_s3 + $0x60] sm:$0xff] }
   0x6   :  { %824 = vmatprep.subr.mxu0 %v53_v3  ;;  %972 = vmatpush3.msra.mxu1 %v432_v9  ;;  %v27_v15 = vld [vmem:[%s1409_s0 + $0x38] sm:$0xff]  ;;  %v28_v17 = vld [vmem:[%s1409_s0 + $0x40] sm:$0xff]  ;;  %v427_v18 = vld [vmem:[%s1410_s3 + $0x50] sm:$0xff] }
   0x7   :  { %825 = vmatpush3.msra.mxu0 %v53_v3  ;;  %v428_v16 = vld [vmem:[%s1410_s3 + $0x58] sm:$0xff]  ;;  %957 = vmatprep.subr.mxu1 %v431_v10  ;;  %v29_v19 = vld [vmem:[%s1409_s0 + $0x48] sm:$0xff]  ;;  %v30_v21 = vld [vmem:[%s1409_s0 + $0x50] sm:$0xff] }
   0x8   :  { %826 = vmatprep.subr.mxu0 %v52_v4  ;;  %973 = vmatpush3.msra.mxu1 %v431_v10  ;;  %v426_v20 = vld [vmem:[%s1410_s3 + $0x48] sm:$0xff]  ;;  %v425_v22 = vld [vmem:[%s1410_s3 + $0x40] sm:$0xff]  ;;  %v31_v23 = vld [vmem:[%s1409_s0 + $0x58] sm:$0xff] }
   0x9   :  { %827 = vmatpush3.msra.mxu0 %v52_v4  ;;  %958 = vmatprep.subr.mxu1 %v430_v12  ;;  %v424_v24 = vld [vmem:[%s1410_s3 + $0x38] sm:$0xff]  ;;  %v32_v25 = vld [vmem:[%s1409_s0 + $0x60] sm:$0xff]  ;;  %v423_v26 = vld [vmem:[%s1410_s3 + $0x30] sm:$0xff] }
   0xa   :  { %829 = vmatmul.mubr.msk.f32.vlgmr.msra.gmra.mxu0 %vm63_vm0, %v21_v5  ;;  %876 = vmatprep.subr.mxu0 %v432_v9  ;;  %v33_v27 = vld [vmem:[%s1409_s0 + $0x68] sm:$0xff]  ;;  %v34_v29 = vld [vmem:[%s1409_s0 + $0x70] sm:$0xff]  ;;  %v421_v30 = vld [vmem:[%s1410_s3 + $0x20] sm:$0xff] }
   0xb   :  { %831 = vmatprep.mubr.msk.f32.mxu0 %vm63_vm0, %v22_v6  ;;  %877 = vmatpush3.msra.mxu0 %v432_v9  ;;  %v422_v28 = vld [vmem:[%s1410_s3 + $0x28] sm:$0xff]  ;;  %v35_v31 = vld [vmem:[%s1409_s0 + $0x78] sm:$0xff]  ;;  %v36_v32 = vld [vmem:[%s1409_s0 + $0x80] sm:$0xff] }
   0xc   :  { %878 = vmatprep.subr.mxu0 %v431_v10  ;;  %974 = vmatpush3.msra.mxu1 %v430_v12  ;;  %v37_v33 = vld [vmem:[%s1409_s0 + $0x88] sm:$0xff]  ;;  %v38_v34 = vld [vmem:[%s1409_s0 + $0x90] sm:$0xff]  ;;  %v39_v35 = vld [vmem:[%s1409_s0 + $0x98] sm:$0xff] }
   0xd   :  { %879 = vmatpush3.msra.mxu0 %v431_v10  ;;  %959 = vmatprep.subr.mxu1 %v429_v14  ;;  %v40_v36 = vld [vmem:[%s1409_s0 + $0xa0] sm:$0xff]  ;;  %v41_v37 = vld [vmem:[%s1409_s0 + $0xa8] sm:$0xff]  ;;  %v42_v38 = vld [vmem:[%s1409_s0 + $0xb0] sm:$0xff] }
   0xe   :  { %832 = vmatmul.mubr.msk.f32.gmra.mxu0 %vm63_vm0, %v23_v7  ;;  %880 = vmatprep.subr.mxu0 %v430_v12  ;;  %v43_v39 = vld [vmem:[%s1409_s0 + $0xb8] sm:$0xff]  ;;  %v44_v40 = vld [vmem:[%s1409_s0 + $0xc0] sm:$0xff]  ;;  %v45_v41 = vld [vmem:[%s1409_s0 + $0xc8] sm:$0xff] }
   0xf   :  { %834 = vmatprep.mubr.msk.f32.mxu0 %vm63_vm0, %v24_v8  ;;  %881 = vmatpush3.msra.mxu0 %v430_v12  ;;  %v46_v42 = vld [vmem:[%s1409_s0 + $0xd0] sm:$0xff]  ;;  %v47_v43 = vld [vmem:[%s1409_s0 + $0xd8] sm:$0xff]  ;;  %v48_v44 = vld [vmem:[%s1409_s0 + $0xe0] sm:$0xff] }
  0x10   :  { %882 = vmatprep.subr.mxu0 %v429_v14  ;;  %975 = vmatpush3.msra.mxu1 %v429_v14  ;;  %v49_v45 = vld [vmem:[%s1409_s0 + $0xe8] sm:$0xff]  ;;  %v50_v46 = vld [vmem:[%s1409_s0 + $0xf0] sm:$0xff]  ;;  %v51_v47 = vld [vmem:[%s1409_s0 + $0xf8] sm:$0xff] }
  0x11   :  { %883 = vmatpush3.msra.mxu0 %v429_v14  ;;  %960 = vmatprep.subr.mxu1 %v428_v16  ;;  %v420_v48 = vld [vmem:[%s1410_s3 + $0x18] sm:$0xff]  ;;  %v419_v49 = vld [vmem:[%s1410_s3 + $0x10] sm:$0xff]  ;;  %v418_v50 = vld [vmem:[%s1410_s3 + $0x8] sm:$0xff] }
  0x12   :  { %835 = vmatmul.mubr.msk.f32.gmra.mxu0 %vm63_vm0, %v25_v11  ;;  %884 = vmatprep.subr.mxu0 %v428_v16  ;;  %v417_v51 = vld [vmem:[%s1410_s3] sm:$0xff] }
  0x13   :  { %837 = vmatprep.mubr.msk.f32.mxu0 %vm63_vm0, %v26_v13  ;;  %885 = vmatpush3.msra.mxu0 %v428_v16  ;;  %v1209_v52 = vld [vmem:[%s1411_s2] ss:$0 sm:$0xff] }
  0x14   :  { %886 = vmatprep.subr.mxu0 %v427_v18  ;;  %976 = vmatpush3.msra.mxu1 %v428_v16 }
  0x15   :  { %887 = vmatpush3.msra.mxu0 %v427_v18  ;;  %961 = vmatprep.subr.mxu1 %v427_v18 }
  0x16   :  { %838 = vmatmul.mubr.msk.f32.gmra.mxu0 %vm63_vm0, %v27_v15  ;;  %888 = vmatprep.subr.mxu0 %v426_v20 }
  0x17   :  { %840 = vmatprep.mubr.msk.f32.mxu0 %vm63_vm0, %v28_v17  ;;  %889 = vmatpush3.msra.mxu0 %v426_v20 }
  0x18   :  { %890 = vmatprep.subr.mxu0 %v425_v22  ;;  %977 = vmatpush3.msra.mxu1 %v427_v18 }
  0x19   :  { %891 = vmatpush3.msra.mxu0 %v425_v22  ;;  %962 = vmatprep.subr.mxu1 %v426_v20 }
  0x1a   :  { %841 = vmatmul.mubr.msk.f32.gmra.mxu0 %vm63_vm0, %v29_v19  ;;  %892 = vmatprep.subr.mxu0 %v424_v24 }
  0x1b   :  { %843 = vmatprep.mubr.msk.f32.mxu0 %vm63_vm0, %v30_v21  ;;  %893 = vmatpush3.msra.mxu0 %v424_v24 }
  0x1c   :  { %894 = vmatprep.subr.mxu0 %v423_v26  ;;  %978 = vmatpush3.msra.mxu1 %v426_v20 }
  0x1d   :  { %895 = vmatpush3.msra.mxu0 %v423_v26  ;;  %963 = vmatprep.subr.mxu1 %v425_v22 }
  0x1e   :  { %844 = vmatmul.mubr.msk.f32.gmra.mxu0 %vm63_vm0, %v31_v23  ;;  %896 = vmatprep.subr.mxu0 %v422_v28 }
  0x1f   :  { %846 = vmatprep.mubr.msk.f32.mxu0 %vm63_vm0, %v32_v25  ;;  %897 = vmatpush3.msra.mxu0 %v422_v28 }
  0x20   :  { %898 = vmatprep.subr.mxu0 %v421_v30  ;;  %979 = vmatpush3.msra.mxu1 %v425_v22 }
  0x21   :  { %899 = vmatpush3.msra.mxu0 %v421_v30  ;;  %964 = vmatprep.subr.mxu1 %v424_v24 }
  0x22   :  { %847 = vmatmul.mubr.msk.f32.gmra.mxu0 %vm63_vm0, %v33_v27  ;;  %980 = vmatpush3.msra.mxu1 %v424_v24 }
  0x23   :  { %849 = vmatprep.mubr.msk.f32.mxu0 %vm63_vm0, %v34_v29  ;;  %965 = vmatprep.subr.mxu1 %v423_v26 }
  0x24   :  { %981 = vmatpush3.msra.mxu1 %v423_v26  ;;  %900 = vmatprep.subr.mxu0 %v420_v48 }
  0x25   :  { %966 = vmatprep.subr.mxu1 %v422_v28  ;;  %901 = vmatpush3.msra.mxu0 %v420_v48 }
  0x26   :  { %850 = vmatmul.mubr.msk.f32.gmra.mxu0 %vm63_vm0, %v35_v31  ;;  %982 = vmatpush3.msra.mxu1 %v422_v28 }
  0x27   :  { %852 = vmatprep.mubr.msk.f32.mxu0 %vm63_vm0, %v36_v32  ;;  %967 = vmatprep.subr.mxu1 %v421_v30 }
  0x28   :  { %983 = vmatpush3.msra.mxu1 %v421_v30  ;;  %902 = vmatprep.subr.mxu0 %v419_v49 }
  0x29   :  { %968 = vmatprep.subr.mxu1 %v420_v48  ;;  %903 = vmatpush3.msra.mxu0 %v419_v49 }
  0x2a   :  { %853 = vmatmul.mubr.msk.f32.gmra.mxu0 %vm63_vm0, %v37_v33  ;;  %984 = vmatpush3.msra.mxu1 %v420_v48 }
  0x2b   :  { %855 = vmatprep.mubr.msk.f32.mxu0 %vm63_vm0, %v38_v34  ;;  %969 = vmatprep.subr.mxu1 %v419_v49 }
  0x2c   :  { %985 = vmatpush3.msra.mxu1 %v419_v49  ;;  %904 = vmatprep.subr.mxu0 %v418_v50 }
  0x2d   :  { %970 = vmatprep.subr.mxu1 %v418_v50  ;;  %905 = vmatpush3.msra.mxu0 %v418_v50 }
  0x2e   :  { %856 = vmatmul.mubr.msk.f32.gmra.mxu0 %vm63_vm0, %v39_v35  ;;  %986 = vmatpush3.msra.mxu1 %v418_v50 }
  0x2f   :  { %858 = vmatprep.mubr.msk.f32.mxu0 %vm63_vm0, %v40_v36  ;;  %906 = vmatprep.subr.mxu0 %v417_v51 }
  0x30   :  { %971 = vmatprep.subr.mxu1 %v417_v51  ;;  %907 = vmatpush3.msra.mxu0 %v417_v51 }
  0x31   :  { %987 = vmatpush3.msra.mxu1 %v417_v51 }
  0x32   :  { %859 = vmatmul.mubr.msk.f32.gmra.mxu0 %vm63_vm0, %v41_v37 }
  0x33   :  { %861 = vmatprep.mubr.msk.f32.mxu0 %vm63_vm0, %v42_v38 }
  0x36   :  { %862 = vmatmul.mubr.msk.f32.gmra.mxu0 %vm63_vm0, %v43_v39 }
  0x37   :  { %864 = vmatprep.mubr.msk.f32.mxu0 %vm63_vm0, %v44_v40 }
  0x3a   :  { %865 = vmatmul.mubr.msk.f32.gmra.mxu0 %vm63_vm0, %v45_v41 }
  0x3b   :  { %867 = vmatprep.mubr.msk.f32.mxu0 %vm63_vm0, %v46_v42 }
  0x3e   :  { %868 = vmatmul.mubr.msk.f32.gmra.mxu0 %vm63_vm0, %v47_v43 }
  0x3f   :  { %870 = vmatprep.mubr.msk.f32.mxu0 %vm63_vm0, %v48_v44 }
  0x42   :  { %871 = vmatmul.mubr.msk.f32.gmra.mxu0 %vm63_vm0, %v49_v45 }
  0x43   :  { %873 = vmatprep.mubr.msk.f32.mxu0 %vm63_vm0, %v50_v46 }
  0x46   :  { %874 = vmatmul.mubr.msk.f32.gmra.mxu0 %vm63_vm0, %v51_v47 }
  0xca   :  { %v830_v53 = vpop.f32.mrf.mxu0 }
  0xcb   :  { %v232_v54 = vadd.f32 %v830_v53, %v1209_v52 }
  0xcc   :  { %v226_v55 = vpop.f32.mrf.mxu0 }
  0xcd   :  { %v227_v56 = vadd.f32 %v1209_v52, %v226_v55  ;;  %v386_v59 = vmax.f32 %v232_v54, 0.0 }
  0xce   :  { %v833_v57 = vpop.f32.mrf.mxu0 }
  0xcf   :  { %v385_v58 = vmax.f32 %v227_v56, 0.0  ;;  %v242_v60 = vadd.f32 %v833_v57, %v1209_v52 }
  0xd0   :  { %v236_v61 = vpop.f32.mrf.mxu0 }
  0xd1   :  { %v237_v62 = vadd.f32 %v1209_v52, %v236_v61  ;;  %908 = vmatprep.mubr.f32.mxu0 %v385_v58  ;;  %v388_v1 = vmax.f32 %v242_v60, 0.0 }
  0xd2   :  { %v836_v63 = vpop.f32.mrf.mxu0  ;;  %909 = vmatmul.mubr.f32.vlgmr.msra.gmra.mxu0 %v386_v59 }
  0xd3   :  { %v387_v0 = vmax.f32 %v237_v62, 0.0  ;;  %v252_v2 = vadd.f32 %v836_v63, %v1209_v52 }
  0xd4   :  { %v246_v3 = vpop.f32.mrf.mxu0 }
  0xd5   :  { %v247_v4 = vadd.f32 %v1209_v52, %v246_v3  ;;  %911 = vmatprep.mubr.f32.mxu0 %v387_v0  ;;  %v390_v7 = vmax.f32 %v252_v2, 0.0 }
  0xd6   :  { %v839_v5 = vpop.f32.mrf.mxu0  ;;  %912 = vmatmul.mubr.f32.gmra.mxu0 %v388_v1 }
  0xd7   :  { %v389_v6 = vmax.f32 %v247_v4, 0.0  ;;  %v262_v8 = vadd.f32 %v839_v5, %v1209_v52 }
  0xd8   :  { %v256_v9 = vpop.f32.mrf.mxu0 }
  0xd9   :  { %914 = vmatprep.mubr.f32.mxu0 %v389_v6  ;;  %v257_v10 = vadd.f32 %v1209_v52, %v256_v9  ;;  %v392_v13 = vmax.f32 %v262_v8, 0.0 }
  0xda   :  { %v842_v11 = vpop.f32.mrf.mxu0  ;;  %915 = vmatmul.mubr.f32.gmra.mxu0 %v390_v7 }
  0xdb   :  { %v391_v12 = vmax.f32 %v257_v10, 0.0  ;;  %v272_v14 = vadd.f32 %v842_v11, %v1209_v52 }
  0xdc   :  { %v266_v15 = vpop.f32.mrf.mxu0 }
  0xdd   :  { %v267_v16 = vadd.f32 %v1209_v52, %v266_v15  ;;  %917 = vmatprep.mubr.f32.mxu1 %v391_v12  ;;  %v394_v19 = vmax.f32 %v272_v14, 0.0 }
  0xde   :  { %v845_v17 = vpop.f32.mrf.mxu0  ;;  %918 = vmatmul.mubr.f32.vlgmr.msra.gmra.mxu1 %v392_v13 }
  0xdf   :  { %v393_v18 = vmax.f32 %v267_v16, 0.0  ;;  %v282_v20 = vadd.f32 %v845_v17, %v1209_v52 }
  0xe0   :  { %v276_v21 = vpop.f32.mrf.mxu0 }
  0xe1   :  { %v277_v22 = vadd.f32 %v1209_v52, %v276_v21  ;;  %920 = vmatprep.mubr.f32.mxu1 %v393_v18  ;;  %v396_v25 = vmax.f32 %v282_v20, 0.0 }
  0xe2   :  { %v848_v23 = vpop.f32.mrf.mxu0  ;;  %921 = vmatmul.mubr.f32.gmra.mxu1 %v394_v19 }
  0xe3   :  { %v395_v24 = vmax.f32 %v277_v22, 0.0  ;;  %v292_v26 = vadd.f32 %v848_v23, %v1209_v52  ;;  %v1246_v22 = vld [vmem:[%s1412_s4] ss:$0 sm:$0xff] }
  0xe4   :  { %v286_v27 = vpop.f32.mrf.mxu0 }
  0xe5   :  { %v287_v28 = vadd.f32 %v1209_v52, %v286_v27  ;;  %923 = vmatprep.mubr.f32.mxu1 %v395_v24  ;;  %v398_v31 = vmax.f32 %v292_v26, 0.0 }
  0xe6   :  { %v851_v29 = vpop.f32.mrf.mxu0  ;;  %924 = vmatmul.mubr.f32.gmra.mxu1 %v396_v25 }
  0xe7   :  { %v397_v30 = vmax.f32 %v287_v28, 0.0  ;;  %v302_v32 = vadd.f32 %v851_v29, %v1209_v52 }
  0xe8   :  { %v296_v33 = vpop.f32.mrf.mxu0 }
  0xe9   :  { %v297_v34 = vadd.f32 %v1209_v52, %v296_v33  ;;  %926 = vmatprep.mubr.f32.mxu1 %v397_v30  ;;  %v400_v37 = vmax.f32 %v302_v32, 0.0 }
  0xea   :  { %v854_v35 = vpop.f32.mrf.mxu0  ;;  %927 = vmatmul.mubr.f32.gmra.mxu1 %v398_v31 }
  0xeb   :  { %v399_v36 = vmax.f32 %v297_v34, 0.0  ;;  %v312_v38 = vadd.f32 %v854_v35, %v1209_v52 }
  0xec   :  { %v306_v39 = vpop.f32.mrf.mxu0 }
  0xed   :  { %v307_v40 = vadd.f32 %v1209_v52, %v306_v39  ;;  %929 = vmatprep.mubr.f32.mxu1 %v399_v36  ;;  %v402_v43 = vmax.f32 %v312_v38, 0.0 }
  0xee   :  { %v857_v41 = vpop.f32.mrf.mxu0  ;;  %930 = vmatmul.mubr.f32.gmra.mxu1 %v400_v37 }
  0xef   :  { %v401_v42 = vmax.f32 %v307_v40, 0.0  ;;  %v322_v44 = vadd.f32 %v857_v41, %v1209_v52 }
  0xf0   :  { %v316_v45 = vpop.f32.mrf.mxu0 }
  0xf1   :  { %v317_v46 = vadd.f32 %v1209_v52, %v316_v45  ;;  %932 = vmatprep.mubr.f32.mxu1 %v401_v42  ;;  %v404_v49 = vmax.f32 %v322_v44, 0.0 }
  0xf2   :  { %v860_v47 = vpop.f32.mrf.mxu0  ;;  %933 = vmatmul.mubr.f32.gmra.mxu1 %v402_v43 }
  0xf3   :  { %v403_v48 = vmax.f32 %v317_v46, 0.0  ;;  %v332_v50 = vadd.f32 %v860_v47, %v1209_v52 }
  0xf4   :  { %v326_v51 = vpop.f32.mrf.mxu0 }
  0xf5   :  { %v327_v53 = vadd.f32 %v1209_v52, %v326_v51  ;;  %935 = vmatprep.mubr.f32.mxu1 %v403_v48  ;;  %v406_v56 = vmax.f32 %v332_v50, 0.0 }
  0xf6   :  { %v863_v54 = vpop.f32.mrf.mxu0  ;;  %936 = vmatmul.mubr.f32.gmra.mxu1 %v404_v49 }
  0xf7   :  { %v405_v55 = vmax.f32 %v327_v53, 0.0  ;;  %v342_v57 = vadd.f32 %v863_v54, %v1209_v52 }
  0xf8   :  { %v336_v58 = vpop.f32.mrf.mxu0 }
  0xf9   :  { %v337_v59 = vadd.f32 %v1209_v52, %v336_v58  ;;  %938 = vmatprep.mubr.f32.mxu1 %v405_v55  ;;  %v408_v62 = vmax.f32 %v342_v57, 0.0 }
  0xfa   :  { %v866_v60 = vpop.f32.mrf.mxu0  ;;  %939 = vmatmul.mubr.f32.gmra.mxu1 %v406_v56 }
  0xfb   :  { %v407_v61 = vmax.f32 %v337_v59, 0.0  ;;  %v352_v63 = vadd.f32 %v866_v60, %v1209_v52 }
  0xfc   :  { %v346_v0 = vpop.f32.mrf.mxu0 }
  0xfd   :  { %v347_v1 = vadd.f32 %v1209_v52, %v346_v0  ;;  %941 = vmatprep.mubr.f32.mxu1 %v407_v61  ;;  %v410_v4 = vmax.f32 %v352_v63, 0.0 }
  0xfe   :  { %v869_v2 = vpop.f32.mrf.mxu0  ;;  %942 = vmatmul.mubr.f32.gmra.mxu1 %v408_v62 }
  0xff   :  { %v409_v3 = vmax.f32 %v347_v1, 0.0  ;;  %v362_v5 = vadd.f32 %v869_v2, %v1209_v52 }
 0x100   :  { %v356_v6 = vpop.f32.mrf.mxu0 }
 0x101   :  { %v357_v7 = vadd.f32 %v1209_v52, %v356_v6  ;;  %944 = vmatprep.mubr.f32.mxu1 %v409_v3  ;;  %v412_v10 = vmax.f32 %v362_v5, 0.0 }
 0x102   :  { %v872_v8 = vpop.f32.mrf.mxu0  ;;  %945 = vmatmul.mubr.f32.gmra.mxu1 %v410_v4 }
 0x103   :  { %v411_v9 = vmax.f32 %v357_v7, 0.0  ;;  %v372_v11 = vadd.f32 %v872_v8, %v1209_v52 }
 0x104   :  { %v366_v12 = vpop.f32.mrf.mxu0 }
 0x105   :  { %v367_v13 = vadd.f32 %v1209_v52, %v366_v12  ;;  %947 = vmatprep.mubr.f32.mxu1 %v411_v9  ;;  %v414_v16 = vmax.f32 %v372_v11, 0.0 }
 0x106   :  { %v875_v14 = vpop.f32.mrf.mxu0  ;;  %948 = vmatmul.mubr.f32.gmra.mxu1 %v412_v10 }
 0x107   :  { %v413_v15 = vmax.f32 %v367_v13, 0.0  ;;  %v382_v17 = vadd.f32 %v875_v14, %v1209_v52 }
 0x108   :  { %v376_v18 = vpop.f32.mrf.mxu0 }
 0x109   :  { %v377_v19 = vadd.f32 %v1209_v52, %v376_v18  ;;  %950 = vmatprep.mubr.f32.mxu1 %v413_v15  ;;  %v416_v21 = vmax.f32 %v382_v17, 0.0 }
 0x10a   :  { %951 = vmatmul.mubr.f32.gmra.mxu1 %v414_v16 }
 0x10b   :  { %v415_v20 = vmax.f32 %v377_v19, 0.0 }
 0x10d   :  { %953 = vmatprep.mubr.f32.mxu1 %v415_v20 }
 0x10e   :  { %954 = vmatmul.mubr.f32.gmra.mxu1 %v416_v21 }
 0x192   :  { %v910_v23 = vpop.f32.mrf.mxu0 }
 0x193   :  { %v512_v24 = vadd.f32 %v910_v23, %v1246_v22 }
 0x194   :  { %v506_v25 = vpop.f32.mrf.mxu0 }
 0x195   :  { %667 = vst.msk [vmem:[%s1413_s5 + $0x8] sm:$0xff] %vm665_vm1, %v512_v24  ;;  %v507_v52 = vadd.f32 %v1246_v22, %v506_v25 }
 0x196   :  { %v913_v26 = vpop.f32.mrf.mxu0 }
 0x197   :  { %666 = vst.msk [vmem:[%s1413_s5] sm:$0xff] %vm665_vm1, %v507_v52  ;;  %v522_v27 = vadd.f32 %v913_v26, %v1246_v22 }
 0x198   :  { %v516_v28 = vpop.f32.mrf.mxu0 }
 0x199   :  { %669 = vst.msk [vmem:[%s1413_s5 + $0x18] sm:$0xff] %vm665_vm1, %v522_v27  ;;  %v517_v29 = vadd.f32 %v1246_v22, %v516_v28 }
 0x19a   :  { %v916_v30 = vpop.f32.mrf.mxu0 }
 0x19b   :  { %668 = vst.msk [vmem:[%s1413_s5 + $0x10] sm:$0xff] %vm665_vm1, %v517_v29  ;;  %v532_v31 = vadd.f32 %v916_v30, %v1246_v22 }
 0x19c   :  { %v526_v32 = vpop.f32.mrf.mxu0 }
 0x19d   :  { %671 = vst.msk [vmem:[%s1413_s5 + $0x28] sm:$0xff] %vm665_vm1, %v532_v31  ;;  %v527_v33 = vadd.f32 %v1246_v22, %v526_v32 }
 0x19e   :  { %v919_v34 = vpop.f32.mrf.mxu1 }
 0x19f   :  { %670 = vst.msk [vmem:[%s1413_s5 + $0x20] sm:$0xff] %vm665_vm1, %v527_v33  ;;  %v542_v35 = vadd.f32 %v919_v34, %v1246_v22 }
 0x1a0   :  { %v536_v36 = vpop.f32.mrf.mxu1 }
 0x1a1   :  { %673 = vst.msk [vmem:[%s1413_s5 + $0x38] sm:$0xff] %vm665_vm1, %v542_v35  ;;  %v537_v37 = vadd.f32 %v1246_v22, %v536_v36 }
 0x1a2   :  { %v922_v38 = vpop.f32.mrf.mxu1 }
 0x1a3   :  { %672 = vst.msk [vmem:[%s1413_s5 + $0x30] sm:$0xff] %vm665_vm1, %v537_v37  ;;  %v552_v39 = vadd.f32 %v922_v38, %v1246_v22 }
 0x1a4   :  { %v546_v40 = vpop.f32.mrf.mxu1 }
 0x1a5   :  { %675 = vst.msk [vmem:[%s1413_s5 + $0x48] sm:$0xff] %vm665_vm1, %v552_v39  ;;  %v547_v41 = vadd.f32 %v1246_v22, %v546_v40 }
 0x1a6   :  { %v925_v42 = vpop.f32.mrf.mxu1 }
 0x1a7   :  { %674 = vst.msk [vmem:[%s1413_s5 + $0x40] sm:$0xff] %vm665_vm1, %v547_v41  ;;  %v562_v43 = vadd.f32 %v925_v42, %v1246_v22 }
 0x1a8   :  { %v556_v44 = vpop.f32.mrf.mxu1 }
 0x1a9   :  { %677 = vst.msk [vmem:[%s1413_s5 + $0x58] sm:$0xff] %vm665_vm1, %v562_v43  ;;  %v557_v45 = vadd.f32 %v1246_v22, %v556_v44 }
 0x1aa   :  { %v928_v46 = vpop.f32.mrf.mxu1 }
 0x1ab   :  { %676 = vst.msk [vmem:[%s1413_s5 + $0x50] sm:$0xff] %vm665_vm1, %v557_v45  ;;  %v572_v47 = vadd.f32 %v928_v46, %v1246_v22 }
 0x1ac   :  { %v566_v48 = vpop.f32.mrf.mxu1 }
 0x1ad   :  { %679 = vst.msk [vmem:[%s1413_s5 + $0x68] sm:$0xff] %vm665_vm1, %v572_v47  ;;  %v567_v49 = vadd.f32 %v1246_v22, %v566_v48 }
 0x1ae   :  { %v931_v50 = vpop.f32.mrf.mxu1 }
 0x1af   :  { %678 = vst.msk [vmem:[%s1413_s5 + $0x60] sm:$0xff] %vm665_vm1, %v567_v49  ;;  %v582_v51 = vadd.f32 %v931_v50, %v1246_v22 }
 0x1b0   :  { %v576_v53 = vpop.f32.mrf.mxu1 }
 0x1b1   :  { %681 = vst.msk [vmem:[%s1413_s5 + $0x78] sm:$0xff] %vm665_vm1, %v582_v51  ;;  %v577_v54 = vadd.f32 %v1246_v22, %v576_v53 }
 0x1b2   :  { %v934_v55 = vpop.f32.mrf.mxu1 }
 0x1b3   :  { %680 = vst.msk [vmem:[%s1413_s5 + $0x70] sm:$0xff] %vm665_vm1, %v577_v54  ;;  %v592_v56 = vadd.f32 %v934_v55, %v1246_v22 }
 0x1b4   :  { %v586_v57 = vpop.f32.mrf.mxu1 }
 0x1b5   :  { %683 = vst.msk [vmem:[%s1413_s5 + $0x88] sm:$0xff] %vm665_vm1, %v592_v56  ;;  %v587_v58 = vadd.f32 %v1246_v22, %v586_v57 }
 0x1b6   :  { %v937_v59 = vpop.f32.mrf.mxu1 }
 0x1b7   :  { %682 = vst.msk [vmem:[%s1413_s5 + $0x80] sm:$0xff] %vm665_vm1, %v587_v58  ;;  %v602_v60 = vadd.f32 %v937_v59, %v1246_v22 }
 0x1b8   :  { %v596_v61 = vpop.f32.mrf.mxu1 }
 0x1b9   :  { %685 = vst.msk [vmem:[%s1413_s5 + $0x98] sm:$0xff] %vm665_vm1, %v602_v60  ;;  %v597_v62 = vadd.f32 %v1246_v22, %v596_v61 }
 0x1ba   :  { %v940_v63 = vpop.f32.mrf.mxu1 }
 0x1bb   :  { %684 = vst.msk [vmem:[%s1413_s5 + $0x90] sm:$0xff] %vm665_vm1, %v597_v62  ;;  %v612_v0 = vadd.f32 %v940_v63, %v1246_v22 }
 0x1bc   :  { %v606_v1 = vpop.f32.mrf.mxu1 }
 0x1bd   :  { %687 = vst.msk [vmem:[%s1413_s5 + $0xa8] sm:$0xff] %vm665_vm1, %v612_v0  ;;  %v607_v2 = vadd.f32 %v1246_v22, %v606_v1 }
 0x1be   :  { %v943_v3 = vpop.f32.mrf.mxu1 }
 0x1bf   :  { %686 = vst.msk [vmem:[%s1413_s5 + $0xa0] sm:$0xff] %vm665_vm1, %v607_v2  ;;  %v622_v4 = vadd.f32 %v943_v3, %v1246_v22 }
 0x1c0   :  { %v616_v5 = vpop.f32.mrf.mxu1 }
 0x1c1   :  { %689 = vst.msk [vmem:[%s1413_s5 + $0xb8] sm:$0xff] %vm665_vm1, %v622_v4  ;;  %v617_v6 = vadd.f32 %v1246_v22, %v616_v5 }
 0x1c2   :  { %v946_v7 = vpop.f32.mrf.mxu1 }
 0x1c3   :  { %688 = vst.msk [vmem:[%s1413_s5 + $0xb0] sm:$0xff] %vm665_vm1, %v617_v6  ;;  %v632_v8 = vadd.f32 %v946_v7, %v1246_v22 }
 0x1c4   :  { %v626_v9 = vpop.f32.mrf.mxu1 }
 0x1c5   :  { %691 = vst.msk [vmem:[%s1413_s5 + $0xc8] sm:$0xff] %vm665_vm1, %v632_v8  ;;  %v627_v10 = vadd.f32 %v1246_v22, %v626_v9 }
 0x1c6   :  { %v949_v11 = vpop.f32.mrf.mxu1 }
 0x1c7   :  { %690 = vst.msk [vmem:[%s1413_s5 + $0xc0] sm:$0xff] %vm665_vm1, %v627_v10  ;;  %v642_v12 = vadd.f32 %v949_v11, %v1246_v22 }
 0x1c8   :  { %v636_v13 = vpop.f32.mrf.mxu1 }
 0x1c9   :  { %693 = vst.msk [vmem:[%s1413_s5 + $0xd8] sm:$0xff] %vm665_vm1, %v642_v12  ;;  %v637_v14 = vadd.f32 %v1246_v22, %v636_v13 }
 0x1ca   :  { %v952_v15 = vpop.f32.mrf.mxu1 }
 0x1cb   :  { %692 = vst.msk [vmem:[%s1413_s5 + $0xd0] sm:$0xff] %vm665_vm1, %v637_v14  ;;  %v652_v16 = vadd.f32 %v952_v15, %v1246_v22 }
 0x1cc   :  { %v646_v17 = vpop.f32.mrf.mxu1 }
 0x1cd   :  { %695 = vst.msk [vmem:[%s1413_s5 + $0xe8] sm:$0xff] %vm665_vm1, %v652_v16  ;;  %v647_v18 = vadd.f32 %v1246_v22, %v646_v17 }
 0x1ce   :  { %v955_v19 = vpop.f32.mrf.mxu1 }
 0x1cf   :  { %694 = vst.msk [vmem:[%s1413_s5 + $0xe0] sm:$0xff] %vm665_vm1, %v647_v18  ;;  %v662_v20 = vadd.f32 %v955_v19, %v1246_v22 }
 0x1d0   :  { %v656_v21 = vpop.f32.mrf.mxu1 }
 0x1d1   :  { %697 = vst.msk [vmem:[%s1413_s5 + $0xf8] sm:$0xff] %vm665_vm1, %v662_v20  ;;  %v657_v23 = vadd.f32 %v1246_v22, %v656_v21 }
 0x1d3   :  { %696 = vst.msk [vmem:[%s1413_s5 + $0xf0] sm:$0xff] %vm665_vm1, %v657_v23 }

</bundles_post_ra>
